<compile_context>
chip_gen: v7x
topology: tpu7x:2x2x1
jax: 0.10.0
libtpu: 0.0.40
codegen_flags: <defaults>
</compile_context>

<pallas_src>
import jax
import jax.numpy as jnp
from jax.experimental import pallas as pl
from jax.experimental.pallas import tpu as pltpu

_LANE = 128
_SUBLANE = 8


def _round_up(x, m):
    return (x + m - 1) // m * m


def mlp_kernel(x_ref, w1_ref, b1_ref, w2_ref, b2_ref, o_ref):
    x = x_ref[...]                  # (tb, F)   f32
    n_feature = x.shape[1]

    if n_feature <= 8:
        # K is tiny (2 for this model): run the first layer on the VPU as
        # broadcast multiply-adds; frees the MXU and avoids a padded-K pass.
        h = b1_ref[...]             # (1, Hp) -> broadcasts over tb rows
        for f in range(n_feature):  # static, fully unrolled
            h = h + x[:, f:f + 1] * w1_ref[f:f + 1, :]
    else:
        h = jnp.dot(x, w1_ref[...], preferred_element_type=jnp.float32) + b1_ref[...]

    h = jnp.tanh(h)                 # EUP

    # Second layer on the MXU: (tb, Hp) @ (Hp, O).  O = 36 (< 128) is stored
    # directly (masked vst) so the HBM output write is only 36 lanes wide.
    y = jnp.dot(h, w2_ref[...], preferred_element_type=jnp.float32)
    o_ref[...] = (y + b2_ref[...]).astype(o_ref.dtype)


def prepare_params(w1, b1, w2, b2):
    """One-time prep: pad the hidden dim to a lane multiple, 2-D biases.

    Zero padding of H is exact: padded h columns are tanh(0 + 0) = 0 and
    multiply the zero rows of the padded w2, contributing nothing.
    The output dim (36) is intentionally NOT padded.
    """
    F, H = w1.shape
    O = w2.shape[1]
    Hp = _round_up(H, _LANE)
    w1p = jnp.pad(w1, ((0, 0), (0, Hp - H)))
    b1p = jnp.pad(jnp.reshape(b1, (1, H)), ((0, 0), (0, Hp - H)))
    w2p = jnp.pad(w2, ((0, Hp - H), (0, 0)))
    b2p = jnp.reshape(b2, (1, O))
    return w1p, b1p, w2p, b2p


def net_forward(x, params, *, tile_b=2048):
    """x: (B, F) f32; params: output of prepare_params()."""
    w1p, b1p, w2p, b2p = params
    B, F = x.shape
    Hp = w1p.shape[1]
    O = w2p.shape[1]

    # Batch tile: as large as practical (amortizes ~0.35 us/step grid
    # overhead), but capped so the grid has >= 2 steps when B allows it
    # (v7x dual-TC sharding via "parallel").  Sublane-aligned.
    tb = min(tile_b, _round_up(pl.cdiv(B, 2), _SUBLANE))
    tb = _round_up(max(tb, _SUBLANE), _SUBLANE)
    grid = (pl.cdiv(B, tb),)   # ragged last block handled by Pallas masking

    # VMEM footprint at tb=2048: x tile (lane-padded) ~1 MiB + out tile
    # ~1 MiB, double-buffered, + resident weights (<0.1 MiB) -> well under
    # the 32 MiB scoped default on v5e/v6e/v7x.
    return pl.pallas_call(
        mlp_kernel,
        out_shape=jax.ShapeDtypeStruct((B, O), x.dtype),
        grid=grid,
        in_specs=[
            pl.BlockSpec((tb, F), lambda i: (i, 0)),     # x: tiled over batch
            pl.BlockSpec((F, Hp), lambda i: (0, 0)),     # weights: VMEM-resident
            pl.BlockSpec((1, Hp), lambda i: (0, 0)),
            pl.BlockSpec((Hp, O), lambda i: (0, 0)),
            pl.BlockSpec((1, O), lambda i: (0, 0)),
        ],
        out_specs=pl.BlockSpec((tb, O), lambda i: (i, 0)),
        compiler_params=pltpu.CompilerParams(
            dimension_semantics=("parallel",),           # v7x: split across TCs
        ),
    )(x, w1p, b1p, w2p, b2p)


def init_params(key, n_feature, n_hidden, n_out=36, dtype=jnp.float32):
    """Deterministic init mimicking nn.Linear's U(-1/sqrt(fan_in), 1/sqrt(fan_in))."""
    k1, k2, k3, k4 = jax.random.split(key, 4)
    bound1 = 1.0 / jnp.sqrt(jnp.float32(n_feature))
    bound2 = 1.0 / jnp.sqrt(jnp.float32(n_hidden))
    w1 = jax.random.uniform(k1, (n_feature, n_hidden), dtype, -bound1, bound1)
    b1 = jax.random.uniform(k2, (1, n_hidden), dtype, -bound1, bound1)
    w2 = jax.random.uniform(k3, (n_hidden, n_out), dtype, -bound2, bound2)
    b2 = jax.random.uniform(k4, (1, n_out), dtype, -bound2, bound2)
    return w1, b1, w2, b2


if __name__ == "__main__":
    # The reference feeds x = df[['transplant_day', 'transplant_week']]
    # => n_feature = 2. Small hidden size and batch for the check.
    n_feature, n_hidden, n_out = 2, 32, 36

    key = jax.random.PRNGKey(0)
    kx, kp, kx2 = jax.random.split(key, 3)
    w1, b1, w2, b2 = init_params(kp, n_feature, n_hidden, n_out)
    params = prepare_params(w1, b1, w2, b2)   # one-time padding, outside fwd

    # Small-batch check (single grid step).
    batch = 8
    x = jax.random.normal(kx, (batch, n_feature), jnp.float32)
    out = jax.block_until_ready(net_forward(x, params))
    ref = jnp.tanh(x @ w1 + b1) @ w2 + b2
    assert out.shape == (batch, n_out)
    assert jnp.allclose(out, ref, atol=1e-5, rtol=1e-5)

    # Larger, non-tile-aligned batch: exercises multi-step grid + ragged
    # last block (no wrapper-side padding/slicing anymore).
    batch2 = 300
    x2 = jax.random.normal(kx2, (batch2, n_feature), jnp.float32)
    out2 = jax.block_until_ready(net_forward(x2, params, tile_b=128))
    ref2 = jnp.tanh(x2 @ w1 + b1) @ w2 + b2
    assert out2.shape == (batch2, n_out)
    assert jnp.allclose(out2, ref2, atol=1e-5, rtol=1e-5)

    print("KERNEL_OK")
</pallas_src>

<mosaic_0001>
module attributes {stable_mosaic.version = 11 : i64} {
  func.func @mlp_kernel(%arg0: i32, %arg1: memref<8x2xf32, #tpu.memory_space<vmem>>, %arg2: memref<2x128xf32, #tpu.memory_space<vmem>>, %arg3: memref<1x128xf32, #tpu.memory_space<vmem>>, %arg4: memref<128x36xf32, #tpu.memory_space<vmem>>, %arg5: memref<1x36xf32, #tpu.memory_space<vmem>>, %arg6: memref<8x36xf32, #tpu.memory_space<vmem>>) attributes {dimension_semantics = [#tpu.dimension_semantics<parallel>], iteration_bounds = array<i64: 1>, scalar_prefetch = 0 : i64, scratch_operands = 0 : i64, tpu.core_type = #tpu.core_type<tc>, window_params = [{transform_indices = @transform_0, window_bounds = array<i64: 8, 2>}, {pipeline_mode = #tpu.pipeline_mode<synchronous>, transform_indices = @transform_1, window_bounds = array<i64: 2, 128>}, {pipeline_mode = #tpu.pipeline_mode<synchronous>, transform_indices = @transform_2, window_bounds = array<i64: 1, 128>}, {pipeline_mode = #tpu.pipeline_mode<synchronous>, transform_indices = @transform_3, window_bounds = array<i64: 128, 36>}, {pipeline_mode = #tpu.pipeline_mode<synchronous>, transform_indices = @transform_4, window_bounds = array<i64: 1, 36>}, {transform_indices = @transform_5, window_bounds = array<i64: 8, 36>}]} {
    %c0 = arith.constant 0 : index
    %c0_0 = arith.constant 0 : index
    %0 = vector.load %arg1[%c0, %c0_0] : memref<8x2xf32, #tpu.memory_space<vmem>>, vector<8x2xf32>
    %c0_1 = arith.constant 0 : index
    %c0_2 = arith.constant 0 : index
    %1 = vector.load %arg3[%c0_1, %c0_2] : memref<1x128xf32, #tpu.memory_space<vmem>>, vector<1x128xf32>
    %2 = vector.extract_strided_slice %0 {offsets = [0, 0], sizes = [8, 1], strides = [1, 1]} : vector<8x2xf32> to vector<8x1xf32>
    %c0_3 = arith.constant 0 : index
    %c0_4 = arith.constant 0 : index
    %3 = vector.load %arg2[%c0_3, %c0_4] : memref<2x128xf32, #tpu.memory_space<vmem>>, vector<1x128xf32>
    %4 = vector.broadcast %2 : vector<8x1xf32> to vector<8x128xf32>
    %5 = vector.broadcast %3 : vector<1x128xf32> to vector<8x128xf32>
    %6 = arith.mulf %4, %5 : vector<8x128xf32>
    %7 = vector.broadcast %1 : vector<1x128xf32> to vector<8x128xf32>
    %8 = arith.addf %7, %6 : vector<8x128xf32>
    %9 = vector.extract_strided_slice %0 {offsets = [0, 1], sizes = [8, 1], strides = [1, 1]} : vector<8x2xf32> to vector<8x1xf32>
    %c1 = arith.constant 1 : index
    %c0_5 = arith.constant 0 : index
    %10 = vector.load %arg2[%c1, %c0_5] : memref<2x128xf32, #tpu.memory_space<vmem>>, vector<1x128xf32>
    %11 = vector.broadcast %9 : vector<8x1xf32> to vector<8x128xf32>
    %12 = vector.broadcast %10 : vector<1x128xf32> to vector<8x128xf32>
    %13 = arith.mulf %11, %12 : vector<8x128xf32>
    %14 = arith.addf %8, %13 : vector<8x128xf32>
    %15 = math.tanh %14 : vector<8x128xf32>
    %c0_6 = arith.constant 0 : index
    %c0_7 = arith.constant 0 : index
    %16 = vector.load %arg4[%c0_6, %c0_7] : memref<128x36xf32, #tpu.memory_space<vmem>>, vector<128x36xf32>
    %cst = arith.constant dense<0.000000e+00> : vector<8x36xf32>
    %17 = tpu.matmul %15, %16, %cst {dimension_numbers = #tpu.dot_dimension_numbers<[1], [0], [0], [1], [0, 0, 1, 1], [], []>} : vector<8x128xf32>, vector<128x36xf32>, vector<8x36xf32> -> vector<8x36xf32>
    %c0_8 = arith.constant 0 : index
    %c0_9 = arith.constant 0 : index
    %18 = vector.load %arg5[%c0_8, %c0_9] : memref<1x36xf32, #tpu.memory_space<vmem>>, vector<1x36xf32>
    %19 = vector.broadcast %18 : vector<1x36xf32> to vector<8x36xf32>
    %20 = arith.addf %17, %19 : vector<8x36xf32>
    %c0_10 = arith.constant 0 : index
    %c0_11 = arith.constant 0 : index
    %21 = vector.load %arg6[%c0_10, %c0_11] : memref<8x36xf32, #tpu.memory_space<vmem>>, vector<8x36xf32>
    tpu.vector_store %arg6[%c0_10, %c0_11], %20 {strides = array<i32>} : memref<8x36xf32, #tpu.memory_space<vmem>>, vector<8x36xf32>,
    return
  }
  func.func @transform_0(%arg0: i32) -> (i32, i32) {
    %c0_i32 = arith.constant 0 : i32
    %c0_i32_0 = arith.constant 0 : i32
    return %arg0, %c0_i32 : i32, i32
  }
  func.func @transform_1(%arg0: i32) -> (i32, i32) {
    %c0_i32 = arith.constant 0 : i32
    %c0_i32_0 = arith.constant 0 : i32
    %c0_i32_1 = arith.constant 0 : i32
    return %c0_i32, %c0_i32_0 : i32, i32
  }
  func.func @transform_2(%arg0: i32) -> (i32, i32) {
    %c0_i32 = arith.constant 0 : i32
    %c0_i32_0 = arith.constant 0 : i32
    %c0_i32_1 = arith.constant 0 : i32
    return %c0_i32, %c0_i32_0 : i32, i32
  }
  func.func @transform_3(%arg0: i32) -> (i32, i32) {
    %c0_i32 = arith.constant 0 : i32
    %c0_i32_0 = arith.constant 0 : i32
    %c0_i32_1 = arith.constant 0 : i32
    return %c0_i32, %c0_i32_0 : i32, i32
  }
  func.func @transform_4(%arg0: i32) -> (i32, i32) {
    %c0_i32 = arith.constant 0 : i32
    %c0_i32_0 = arith.constant 0 : i32
    %c0_i32_1 = arith.constant 0 : i32
    return %c0_i32, %c0_i32_0 : i32, i32
  }
  func.func @transform_5(%arg0: i32) -> (i32, i32) {
    %c0_i32 = arith.constant 0 : i32
    %c0_i32_0 = arith.constant 0 : i32
    return %arg0, %c0_i32 : i32, i32
  }
}

</mosaic_0001>

<bundles_post_ra>
// kernel: tpu_custom_call.1
= control target key start
LH: loop header
LB: loop body
LE: loop exit
PB: predicated region body
PF: predicated region fallthrough
CT: control target
= control target key end

     0   :  { %v276_v3 = vmov 0   ;;  %v277_v4 = vmov 0.0|0.0   ;;  %s387_s0 = inlined_call_operand.vmem [shape: f32[8,2], index: 0, kind: input, shape index: {}]   ;;  %s388_s1 = inlined_call_operand.vmem [shape: f32[2,128], index: 1, kind: input, shape index: {}]   ;;  %s389_s2 = inlined_call_operand.vmem [shape: f32[1,128], index: 2, kind: input, shape index: {}]   ;;  %s390_s3 = inlined_call_operand.vmem [shape: f32[128,36], index: 3, kind: input, shape index: {}]   ;;  %s391_s4 = inlined_call_operand.vmem [shape: f32[1,36], index: 4, kind: input, shape index: {}]   ;;  %s392_s5 = inlined_call_operand.hbm [shape: f32[8,36], index: 5, kind: output, shape index: {}]  }
   0x1   :  { %v21_v0 = vld [vmem:[%s387_s0] sm:$0xff]  ;;  %v54_v2 = vld [vmem:[%s390_s3 + $0x8] sm:$0xff]  ;;  %248 = vset.pattern.permute.xlu0 %v276_v3  ;;  %218 = vmatprep.subr.bf16.mxu0 %v277_v4  ;;  %v55_v6 = vld [vmem:[%s390_s3 + $0x10] sm:$0xff] }
   0x2   :  { %v53_v1 = vld [vmem:[%s390_s3] sm:$0xff]  ;;  %v56_v7 = vld [vmem:[%s390_s3 + $0x18] sm:$0xff]  ;;  %26 = vperm.xlu0 %248, %v21_v0  }
   0x3   :  { %v219_v5 = vpack.c.bf16 %v54_v2, %v53_v1  ;;  %v222_v8 = vpack.c.bf16 %v56_v7, %v55_v6 }
   0x5   :  { %220 = vmatpush3.bf16.msra.mxu0 %v219_v5 }
   0x6   :  { %10 = vsyncpa [#allocation3], 0  ;;  %221 = vmatprep.subr.bf16.mxu0 %v277_v4  ;;  %v57_v9 = vld [vmem:[%s390_s3 + $0x20] sm:$0xff]  ;;  %v58_v10 = vld [vmem:[%s390_s3 + $0x28] sm:$0xff]  ;;  %v278_v11 = vmov 1   ;;  %vm279_vm0 = vmmov 0  }
   0x7   :  { %249 = vset.pattern.permute.xlu0 %v278_v11  ;;  %v225_v12 = vpack.c.bf16 %v58_v10, %v57_v9  ;;  %v59_v13 = vld [vmem:[%s390_s3 + $0x30] sm:$0xff]  ;;  %v60_v14 = vld [vmem:[%s390_s3 + $0x38] sm:$0xff]  ;;  %v61_v16 = vld [vmem:[%s390_s3 + $0x40] sm:$0xff]  ;;  %v280_v18 = vmov 0.0   ;;  %s281_s7 = smov [#allocation2]   ;;  %vm146_vm1 = vcmask 293888  }
   0x8   :  { %43 = vperm.xlu0 %249, %v21_v0   ;;  %v228_v15 = vpack.c.bf16 %v60_v14, %v59_v13  ;;  %v62_v17 = vld [vmem:[%s390_s3 + $0x48] sm:$0xff]  ;;  %215 = vmatprep.mubr.msk.f32.mxu0 %vm279_vm0, %v280_v18  ;;  %v63_v20 = vld [vmem:[%s390_s3 + $0x50] sm:$0xff]  ;;  %v64_v21 = vld [vmem:[%s390_s3 + $0x58] sm:$0xff]  ;;  %s154_s8 = sshll.u32 %s281_s7, 4  ;;  %s155_s8 = int_to_ptr.vmem [resolvable:$true] %s154_s8 }
   0x9   :  { %223 = vmatpush3.bf16.msra.mxu0 %v222_v8  ;;  %v231_v19 = vpack.c.bf16 %v62_v17, %v61_v16  ;;  %v234_v22 = vpack.c.bf16 %v64_v21, %v63_v20  ;;  %v65_v23 = vld [vmem:[%s390_s3 + $0x60] sm:$0xff]  ;;  %v66_v24 = vld [vmem:[%s390_s3 + $0x68] sm:$0xff]  ;;  %v67_v26 = vld [vmem:[%s390_s3 + $0x70] sm:$0xff]  ;;  %p257_p1 = scmp.lt.s32.totalorder %s155_s8, %s155_s8 }
   0xa   :  { %224 = vmatprep.subr.bf16.mxu0 %v277_v4  ;;  %v237_v25 = vpack.c.bf16 %v66_v24, %v65_v23  ;;  %v68_v27 = vld [vmem:[%s390_s3 + $0x78] sm:$0xff]  ;;  %v162_v29 = vld [vmem:[%s388_s1] ss:$0 sm:$0xff]  ;;  %v164_v33 = vld [vmem:[%s388_s1 + $0x1] ss:$0 sm:$0xff]  ;;  %s252_s1 = scalar_lea.vmem %s155_s8, 128 }
   0xb   :  { %v240_v28 = vpack.c.bf16 %v68_v27, %v67_v26  ;;  %v163_v32 = vld [vmem:[%s389_s2] ss:$0 sm:$0xff]  ;;  %p253_p0 = scmp.ne.s32.totalorder %s155_s8, %s252_s1  ;;  %p258_p2 = scmp.lt.s32.totalorder %s252_s1, %s252_s1 }
   0xc   :  { %v165_v39 = vld [vmem:[%s391_s4] ss:$0 sm:$0xff] }
   0xd   :  { %226 = vmatpush3.bf16.msra.mxu0 %v225_v12  ;;  %p259_p3 = por %p258_p2, %p257_p1 }
   0xe   :  { %227 = vmatprep.subr.bf16.mxu0 %v277_v4 }
   0xf   :  { %p260_p4 = pnand %p259_p3, %p253_p0 }
  0x11   :  { %229 = vmatpush3.bf16.msra.mxu0 %v228_v15 }
  0x12   :  { %230 = vmatprep.subr.bf16.mxu0 %v277_v4 }
  0x15   :  { %232 = vmatpush3.bf16.msra.mxu0 %v231_v19 }
  0x16   :  { %233 = vmatprep.subr.bf16.mxu0 %v277_v4 }
  0x19   :  { %235 = vmatpush3.bf16.msra.mxu0 %v234_v22 }
  0x1a   :  { %236 = vmatprep.subr.bf16.mxu0 %v277_v4 }
  0x1d   :  { %238 = vmatpush3.bf16.msra.mxu0 %v237_v25 }
  0x1e   :  { %239 = vmatprep.subr.bf16.mxu0 %v277_v4 }
  0x21   :  { %241 = vmatpush3.bf16.msra.mxu0 %v240_v28 }
  0x81   :  { %v27_v30 = vpop.permute.xlu0 %26 }
  0x82   :  { %v33_v31 = vmul.f32 %v162_v29, %v27_v30 }
  0x84   :  { %v40_v35 = vadd.f32 %v163_v32, %v33_v31 }
  0x87   :  { %v44_v34 = vpop.permute.xlu0 %43 }
  0x88   :  { %v50_v36 = vmul.f32 %v164_v33, %v44_v34 }
  0x8a   :  { %v51_v37 = vadd.f32 %v50_v36, %v40_v35 }
  0x8c   :  { %250 = vtanh.f32 %v51_v37 }
  0x96   :  { %v251_v38 = vpop.eup %250 }
  0x97   :  { %216 = vmatmul.mubr.f32.vlgmr.msra.gmra.mrb[0].mxu0 %v251_v38 }
 0x16a   :  { %v142_v40 = vpop.f32.mrb[0].mxu0 }
 0x16b   :  { %v143_v41 = vadd.f32 %v165_v39, %v142_v40  ;;  %v217_v42 = vpop.f32.mrb[1].mxu0 }
 0x16d   :  { %147 = vst.msk [vmem:[#allocation2] sm:$0xff] %vm146_vm1, %v143_v41 }
 0x16e   :  { %263 = shalt.err (!%p260_p4)
}
 0x16f   :  { %s264_s10 = scalar_lea.hbm %s392_s5, 128 }
 0x170   :  { %p265_p5 = scmp.ne.s32.totalorder %s392_s5, %s264_s10  ;;  %p268_p6 = scmp.lt.u32.totalorder %s264_s10, %s392_s5 }
 0x172   :  { %p270_p7 = pnand %p268_p6, %p265_p5 }
 0x174   :  { %273 = shalt.err (!%p270_p7)
}
 0x175   :  { %157 = dma.vmem_to_hbm [thread:$0]  %s155_s8, 128, %s392_s5, [#allocation3]  }
 0x176   :  { %274 = dma.done.wait [#allocation3], 128  }
 0x177   :  { %275 = vsyncadd [#allocation3], 4294967168 }
 0x178   :  { %161 = vsyncpa [#allocation3], 1 }

</bundles_post_ra>
